<compile_context>
chip_gen: v7x
topology: tpu7x:2x2x1
jax: 0.10.0
libtpu: 0.0.40
codegen_flags: <defaults>
</compile_context>

<pallas_src>
import jax
import jax.numpy as jnp
from jax.experimental import pallas as pl
from jax.experimental.pallas import tpu as pltpu


def _scale_kernel(x_ref, gb_ref, y_ref):
    # x_ref / y_ref: (block_rows, block_lanes) VMEM tile (lane-dense)
    # gb_ref:        (block_rows, 2) f32 VMEM tile; col 0 = gamma, col 1 = beta
    x = x_ref[...].astype(jnp.float32)
    gb = gb_ref[...]
    g = gb[:, 0:1]                      # (block_rows, 1) -> lane broadcast
    b = gb[:, 1:2]
    y_ref[...] = (x * g + b).astype(y_ref.dtype)


def _default_target_block_bytes():
    """Per-generation DMA block target (pure HBM-roofline kernel)."""
    try:
        kind = jax.devices()[0].device_kind.lower()
    except Exception:
        return 4 << 20
    if "v5 lite" in kind or "v5e" in kind or "v5litepod" in kind:
        return 2 << 20          # ~7% per-step overhead already; keep modest
    if "v6" in kind:
        return 5 << 20          # roofline knee ~4 MiB on v6e
    if "v7" in kind:
        return 8 << 20          # 3.2 TB/s HBM -> need big steps to hide 0.35us
    return 4 << 20


def _choose_blocks(R, L, itemsize, target_block_bytes):
    """Pick (block_rows, block_lanes) honoring the (8,128) rule + VMEM budget."""
    # ---- lane (last-dim) tiling -------------------------------------------
    # Keep the full row when 8 sublanes of it fit the byte target (or L<=128);
    # otherwise tile lanes in multiples of 128 so large H*W never exceeds the
    # scoped-VMEM limit on any generation.
    if L <= 128 or 8 * L * itemsize <= target_block_bytes:
        block_lanes = L                                   # full dim -> always valid
    else:
        max_lanes = max(128, (target_block_bytes // (8 * itemsize) // 128) * 128)
        block_lanes = max_lanes                           # < L by construction

    # ---- row (sublane) tiling ---------------------------------------------
    # Per-row VMEM cost of a step: x-tile row + lane-padded (128-wide) f32
    # gamma/beta row.  Account for it so the budget math has no surprises.
    row_bytes = block_lanes * itemsize + 128 * 4
    rows_for_target = max(8, (target_block_bytes // row_bytes // 8) * 8)
    block_rows = R if rows_for_target >= R else rows_for_target

    # ---- megacore: prefer >=2 blocks so both v7x TensorCores get work ------
    lane_blocks = pl.cdiv(L, block_lanes)
    if block_rows == R and lane_blocks == 1 and R >= 16:
        half = ((R + 1) // 2 + 7) // 8 * 8                # multiple of 8
        if half < R:
            block_rows = half                             # -> 2 row blocks
    return block_rows, block_lanes


def scale_forward(x, gamma, beta, *, target_block_bytes=None, donate_x=False):
    """y[:, i, :, :] = x[:, i, :, :] * gamma[i] + beta[i] for NCHW x."""
    N, C, H, W = x.shape
    assert gamma.shape == (C,) and beta.shape == (C,)

    R = N * C          # row axis: (batch, channel) flattened -> sublanes
    L = H * W          # lane axis: spatial flattened -> lane-dense

    # Lane-dense 2D view (contiguous reshape, free in XLA).
    x2 = x.reshape(R, L)

    # Per-row (gamma, beta) packed into one (R, 2) f32 array: row r = n*C + c
    # carries (gamma[c], beta[c]).
    g_rows = jnp.broadcast_to(gamma.astype(jnp.float32)[None, :], (N, C)).reshape(R)
    b_rows = jnp.broadcast_to(beta.astype(jnp.float32)[None, :], (N, C)).reshape(R)
    gb = jnp.stack([g_rows, b_rows], axis=-1)             # (R, 2)

    itemsize = jnp.dtype(x.dtype).itemsize
    if target_block_bytes is None:
        target_block_bytes = _default_target_block_bytes()

    block_rows, block_lanes = _choose_blocks(R, L, itemsize, target_block_bytes)
    grid = (pl.cdiv(R, block_rows), pl.cdiv(L, block_lanes))

    # Explicit scoped-VMEM budget: double-buffered x-in + y-out tiles, plus
    # the double-buffered lane-padded (block_rows, 128) f32 gamma/beta tile,
    # plus slack for compiler internals.  Capped well under v7x's 64 MiB
    # physical VMEM.
    x_tile_bytes = block_rows * block_lanes * itemsize
    gb_tile_bytes = block_rows * 128 * 4
    vmem_limit = min(max(4 * x_tile_bytes + 2 * gb_tile_bytes + (2 << 20),
                         16 << 20),
                     44 << 20)

    # Advisory: bandwidth-bound elementwise op (lets XLA overlap neighbors).
    cost = pl.CostEstimate(
        flops=2 * R * L,
        transcendentals=0,
        bytes_accessed=2 * R * L * itemsize + gb.size * 4,
    )

    y2 = pl.pallas_call(
        _scale_kernel,
        out_shape=jax.ShapeDtypeStruct((R, L), x.dtype),
        grid_spec=pl.GridSpec(
            grid=grid,
            in_specs=[
                pl.BlockSpec((block_rows, block_lanes), lambda i, j: (i, j)),
                pl.BlockSpec((block_rows, 2), lambda i, j: (i, 0)),
            ],
            out_specs=pl.BlockSpec((block_rows, block_lanes), lambda i, j: (i, j)),
        ),
        compiler_params=pltpu.CompilerParams(
            # Row and lane blocks are fully independent -> shard across TCs.
            dimension_semantics=("parallel", "parallel"),
            vmem_limit_bytes=vmem_limit,
        ),
        cost_estimate=cost,
        # Optional buffer reuse when the caller can donate x (same shape/dtype).
        input_output_aliases=({0: 0} if donate_x else {}),
    )(x2, gb)

    return y2.reshape(N, C, H, W)


if __name__ == "__main__":
    key = jax.random.PRNGKey(0)
    kx, kg, kb, kx2 = jax.random.split(key, 4)

    # --- Test 1: small shapes consistent with Scale(num_feature=4), NCHW ----
    N, C, H, W = 2, 4, 16, 16
    x = jax.random.normal(kx, (N, C, H, W), dtype=jnp.float32)

    # Module __init__ is ones/zeros; perturb deterministically so the affine
    # transform is non-trivial to verify.
    gamma = jnp.ones((C,), jnp.float32) + 0.1 * jax.random.normal(kg, (C,), jnp.float32)
    beta = 0.1 * jax.random.normal(kb, (C,), jnp.float32)

    y = scale_forward(x, gamma, beta)
    jax.block_until_ready(y)

    ref = x * gamma[None, :, None, None] + beta[None, :, None, None]
    assert y.shape == x.shape and y.dtype == x.dtype
    assert jnp.allclose(y, ref, atol=1e-6, rtol=1e-6), "mismatch vs reference (test 1)"

    # --- Test 2: force the lane-tiled (2D grid) path with a tiny byte target -
    H2 = W2 = 64
    x_big = jax.random.normal(kx2, (N, C, H2, W2), dtype=jnp.float32)
    y_big = scale_forward(x_big, gamma, beta, target_block_bytes=64 * 1024)
    jax.block_until_ready(y_big)
    ref_big = x_big * gamma[None, :, None, None] + beta[None, :, None, None]
    assert jnp.allclose(y_big, ref_big, atol=1e-6, rtol=1e-6), "mismatch vs reference (test 2)"

    print("KERNEL_OK")
</pallas_src>

<mosaic_0001>
module attributes {stable_mosaic.version = 11 : i64} {
  func.func @_scale_kernel(%arg0: i32, %arg1: i32, %arg2: memref<8x256xf32, #tpu.memory_space<vmem>>, %arg3: memref<8x2xf32, #tpu.memory_space<vmem>>, %arg4: memref<8x256xf32, #tpu.memory_space<vmem>>) attributes {dimension_semantics = [#tpu.dimension_semantics<parallel>, #tpu.dimension_semantics<parallel>], iteration_bounds = array<i64: 1, 1>, scalar_prefetch = 0 : i64, scratch_operands = 0 : i64, tpu.core_type = #tpu.core_type<tc>, window_params = [{transform_indices = @transform_0, window_bounds = array<i64: 8, 256>}, {transform_indices = @transform_1, window_bounds = array<i64: 8, 2>}, {transform_indices = @transform_2, window_bounds = array<i64: 8, 256>}]} {
    %c0 = arith.constant 0 : index
    %c0_0 = arith.constant 0 : index
    %0 = vector.load %arg2[%c0, %c0_0] : memref<8x256xf32, #tpu.memory_space<vmem>>, vector<8x256xf32>
    %c0_1 = arith.constant 0 : index
    %c0_2 = arith.constant 0 : index
    %1 = vector.load %arg3[%c0_1, %c0_2] : memref<8x2xf32, #tpu.memory_space<vmem>>, vector<8x2xf32>
    %2 = vector.extract_strided_slice %1 {offsets = [0, 0], sizes = [8, 1], strides = [1, 1]} : vector<8x2xf32> to vector<8x1xf32>
    %3 = vector.extract_strided_slice %1 {offsets = [0, 1], sizes = [8, 1], strides = [1, 1]} : vector<8x2xf32> to vector<8x1xf32>
    %4 = vector.broadcast %2 : vector<8x1xf32> to vector<8x256xf32>
    %5 = arith.mulf %0, %4 : vector<8x256xf32>
    %6 = vector.broadcast %3 : vector<8x1xf32> to vector<8x256xf32>
    %7 = arith.addf %5, %6 : vector<8x256xf32>
    %c0_3 = arith.constant 0 : index
    %c0_4 = arith.constant 0 : index
    %8 = vector.load %arg4[%c0_3, %c0_4] : memref<8x256xf32, #tpu.memory_space<vmem>>, vector<8x256xf32>
    tpu.vector_store %arg4[%c0_3, %c0_4], %7 {strides = array<i32>} : memref<8x256xf32, #tpu.memory_space<vmem>>, vector<8x256xf32>,
    return
  }
  func.func @transform_0(%arg0: i32, %arg1: i32) -> (i32, i32) {
    %c0_i32 = arith.constant 0 : i32
    return %arg0, %arg1 : i32, i32
  }
  func.func @transform_1(%arg0: i32, %arg1: i32) -> (i32, i32) {
    %c0_i32 = arith.constant 0 : i32
    %c0_i32_0 = arith.constant 0 : i32
    return %arg0, %c0_i32 : i32, i32
  }
  func.func @transform_2(%arg0: i32, %arg1: i32) -> (i32, i32) {
    %c0_i32 = arith.constant 0 : i32
    return %arg0, %arg1 : i32, i32
  }
}

</mosaic_0001>

<bundles_post_ra>
// kernel: tpu_custom_call.1
= control target key start
LH: loop header
LB: loop body
LE: loop exit
PB: predicated region body
PF: predicated region fallthrough
CT: control target
= control target key end

     0   :  { %7 = vsyncpa [#allocation3], 0  ;;  %s157_s0 = inlined_call_operand.hbm [shape: f32[8,256], index: 0, kind: input, shape index: {}]   ;;  %s158_s1 = inlined_call_operand.vmem [shape: f32[8,2], index: 1, kind: input, shape index: {}]   ;;  %s159_s2 = inlined_call_operand.hbm [shape: f32[8,256], index: 2, kind: output, shape index: {}]  }
   0x1   :  { %8 = vsyncpa [#allocation4], 0  ;;  %s111_s9 = smov [#allocation2]   ;;  %s63_s13 = scalar_lea.hbm %s157_s0, 256 }
   0x2   :  { %s15_s10 = sshll.u32 %s111_s9, 4  ;;  %p64_p0 = scmp.ne.s32.totalorder %s157_s0, %s63_s13  ;;  %s16_s10 = int_to_ptr.vmem [resolvable:$true] %s15_s10 }
   0x3   :  { %p67_p1 = scmp.lt.u32.totalorder %s63_s13, %s157_s0 }
   0x5   :  { %p69_p2 = pnand %p67_p1, %p64_p0 }
   0x7   :  { %72 = shalt.err (!%p69_p2)
}
   0x8   :  { %s73_s18 = scalar_lea.vmem %s16_s10, 256  ;;  %p78_p4 = scmp.lt.s32.totalorder %s16_s10, %s16_s10 }
   0x9   :  { %p74_p3 = scmp.ne.s32.totalorder %s16_s10, %s73_s18  ;;  %p79_p5 = scmp.lt.s32.totalorder %s73_s18, %s73_s18 }
   0xb   :  { %p80_p6 = por %p79_p5, %p78_p4 }
   0xd   :  { %p81_p7 = pnand %p80_p6, %p74_p3 }
   0xf   :  { %84 = shalt.err (!%p81_p7)
}
  0x10   :  { %18 = dma.hbm_to_vmem [thread:$0]  %s157_s0, 256, %s16_s10, [#allocation3]  }
  0x11   :  { %107 = dma.done.wait [#allocation3], 256  }
  0x12   :  { %108 = vsyncadd [#allocation3], 4294967040  ;;  %v112_v0 = vmov 0   ;;  %v26_v1 = vld [vmem:[%s158_s1] sm:$0xff]  ;;  %v113_v2 = vmov 1   ;;  %v25_v5 = vld [vmem:[#allocation2 + $0x8] sm:$0xff] }
  0x13   :  { %61 = vset.pattern.permute.xlu0 %v112_v0  ;;  %v24_v4 = vld [vmem:[#allocation2] sm:$0xff]  ;;  %s114_s23 = smov [#allocation5]  }
  0x14   :  { %29 = vperm.xlu0 %61, %v26_v1   ;;  %s48_s24 = sshll.u32 %s114_s23, 4  ;;  %s49_s24 = int_to_ptr.vmem [resolvable:$true] %s48_s24 }
  0x15   :  { %s85_s0 = scalar_lea.vmem %s49_s24, 256  ;;  %p90_p9 = scmp.lt.s32.totalorder %s49_s24, %s49_s24 }
  0x16   :  { %p86_p8 = scmp.ne.s32.totalorder %s49_s24, %s85_s0  ;;  %p91_p10 = scmp.lt.s32.totalorder %s85_s0, %s85_s0 }
  0x18   :  { %62 = vset.pattern.permute.xlu0 %v113_v2  ;;  %p92_p11 = por %p91_p10, %p90_p9 }
  0x19   :  { %35 = vperm.xlu0 %62, %v26_v1  }
  0x1a   :  { %p93_p12 = pnand %p92_p11, %p86_p8 }
  0x93   :  { %v30_v3 = vpop.permute.xlu0 %29 }
  0x94   :  { %v32_v6 = vmul.f32 %v30_v3, %v24_v4  ;;  %v33_v7 = vmul.f32 %v30_v3, %v25_v5 }
  0x98   :  { %v36_v8 = vpop.permute.xlu0 %35 }
  0x99   :  { %v38_v9 = vadd.f32 %v36_v8, %v32_v6  ;;  %v39_v10 = vadd.f32 %v36_v8, %v33_v7 }
  0x9b   :  { %40 = vst [vmem:[#allocation5] sm:$0xff] %v38_v9  ;;  %41 = vst [vmem:[#allocation5 + $0x8] sm:$0xff] %v39_v10 }
  0x9c   :  { %96 = shalt.err (!%p93_p12)
}
  0x9d   :  { %s97_s26 = scalar_lea.hbm %s159_s2, 256 }
  0x9e   :  { %p98_p13 = scmp.ne.s32.totalorder %s159_s2, %s97_s26  ;;  %p101_p0 = scmp.lt.u32.totalorder %s97_s26, %s159_s2 }
  0xa0   :  { %p103_p1 = pnand %p101_p0, %p98_p13 }
  0xa2   :  { %106 = shalt.err (!%p103_p1)
}
  0xa3   :  { %51 = dma.vmem_to_hbm [thread:$0]  %s49_s24, 256, %s159_s2, [#allocation4]  }
  0xa4   :  { %109 = dma.done.wait [#allocation4], 256  }
  0xa5   :  { %110 = vsyncadd [#allocation4], 4294967040 }
  0xa6   :  { %55 = vsyncpa [#allocation3], 1 }
  0xa7   :  { %56 = vsyncpa [#allocation4], 1 }

</bundles_post_ra>
